<compile_context>
chip_gen: v7x
topology: tpu7x:2x2x1
jax: 0.10.0
libtpu: 0.0.40
codegen_flags: <defaults>
</compile_context>

<pallas_src>
import functools

import jax
import jax.numpy as jnp
from jax.experimental import pallas as pl
from jax.experimental.pallas import tpu as pltpu


def _cdiv(a: int, b: int) -> int:
    return -(-a // b)


def _round_up(x: int, m: int) -> int:
    return ((x + m - 1) // m) * m


# ---------------------------------------------------------------------------
# Fast path: embedding table resident in VMEM, gather via dynamic vector loads.
# ---------------------------------------------------------------------------
def _vmem_gather_kernel(tok_ref, table_ref, out_ref):
    # tok_ref:   (Np,)  int32 in SMEM (scalar-prefetched flat token ids)
    # table_ref: (V, E) table, resident in VMEM (constant-index block)
    # out_ref:   (rt, E) VMEM output tile for this grid step
    row_tile = out_ref.shape[0]
    base = pl.program_id(0) * row_tile

    def _copy_row(r, carry):
        idx = tok_ref[base + r]                              # SMEM scalar read
        out_ref[pl.ds(r, 1), :] = table_ref[pl.ds(idx, 1), :]  # in-VMEM gather
        return carry

    # Unrolled so scalar address math for row r+1 overlaps the vld/vst of row r.
    jax.lax.fori_loop(0, row_tile, _copy_row, 0, unroll=8)


# ---------------------------------------------------------------------------
# Fallback: table stays in HBM, per-row DMA gather into the output tile.
# ---------------------------------------------------------------------------
def _hbm_gather_kernel(tok_ref, table_hbm, out_ref, sem):
    # tok_ref:   (Np,)  int32 in SMEM
    # table_hbm: (V, E) embedding table left in HBM (pl.ANY)
    # out_ref:   (rt, E) VMEM output tile
    # sem:       single DMA semaphore shared by every row copy of this tile
    row_tile = out_ref.shape[0]
    vocab = table_hbm.shape[0]
    base = pl.program_id(0) * row_tile

    def _issue_row(r, carry):
        idx = tok_ref[base + r]
        pltpu.make_async_copy(
            table_hbm.at[pl.ds(idx, 1), :],     # (1, E) row in HBM
            out_ref.at[pl.ds(r, 1), :],         # (1, E) row of the output tile
            sem,
        ).start()
        return carry

    # Unrolled issue loop: descriptor pushes overlap scalar work for later rows.
    jax.lax.fori_loop(0, row_tile, _issue_row, 0, unroll=8)

    # Drain: every row copy is (1, E) of the same dtype and signals `sem`
    # (DMA semaphores count bytes), so ONE wait sized to n_agg rows plus
    # (row_tile - n_agg) single-row waits drains them all.  n_agg == row_tile
    # whenever row_tile <= vocab, which the wrapper guarantees for any table
    # large enough to take this path, so the extra loop is statically empty.
    n_agg = min(row_tile, vocab)
    pltpu.make_async_copy(
        table_hbm.at[pl.ds(0, n_agg), :],
        out_ref.at[pl.ds(0, n_agg), :],
        sem,
    ).wait()
    for _ in range(row_tile - n_agg):           # statically empty in practice
        pltpu.make_async_copy(
            table_hbm.at[pl.ds(0, 1), :],
            out_ref.at[pl.ds(0, 1), :],
            sem,
        ).wait()


@functools.partial(
    jax.jit, static_argnames=("target_tile_bytes", "table_vmem_limit_bytes")
)
def token_embedding(
    tokens,
    table,
    *,
    target_tile_bytes: int = 2 << 20,        # ~2 MiB of output rows per step
    table_vmem_limit_bytes: int = 12 << 20,   # resident-table threshold
):
    """tokens: (B, S) int; table: (V, E) float -> (B, S, E) float."""
    B, S = tokens.shape
    V, E = table.shape
    N = B * S
    itemsize = jnp.dtype(table.dtype).itemsize
    row_bytes = E * itemsize
    table_bytes = V * row_bytes

    # Rows per grid step: multiple of 8 sublanes, sized for ~target_tile_bytes
    # of output, capped so there are at least two grid steps when N > 8 so the
    # "parallel" axis can shard across v7x's two TensorCores.
    rt = max(8, (target_tile_bytes // max(row_bytes, 1)) // 8 * 8)
    rt = min(rt, 4096)
    rt = min(rt, max(8, _round_up(_cdiv(N, 2), 8)))

    grid = _cdiv(N, rt)
    Np = grid * rt

    flat_tok = tokens.reshape(N).astype(jnp.int32)
    # Clamp ids (jnp.take-style) so bad / padded ids can never form an
    # out-of-bounds address.  (PyTorch nn.Embedding would raise instead.)
    flat_tok = jnp.clip(flat_tok, 0, V - 1)
    if Np != N:
        # Only the tiny int32 id vector is padded; the (N, E) output is emitted
        # at its exact size and Pallas masks the partial last block.
        flat_tok = jnp.pad(flat_tok, (0, Np - N))

    out_tile_bytes = rt * row_bytes
    use_vmem_table = table_bytes <= table_vmem_limit_bytes

    if use_vmem_table:
        kernel = _vmem_gather_kernel
        # Whole table as one block with a constant index_map: DMA'd into VMEM
        # once and reused by every grid step.
        table_spec = pl.BlockSpec((V, E), lambda i, tok: (0, 0))
        scratch_shapes = ()
        vmem_needed = 2 * table_bytes + 2 * out_tile_bytes + (2 << 20)
    else:
        kernel = _hbm_gather_kernel
        table_spec = pl.BlockSpec(memory_space=pl.ANY)       # stays in HBM
        scratch_shapes = (pltpu.SemaphoreType.DMA(()),)
        vmem_needed = 2 * out_tile_bytes + (2 << 20)
        # In this path table_bytes > table_vmem_limit_bytes > out_tile_bytes,
        # hence rt < V and the aggregate-wait descriptor is a legal region.

    # Raise the scoped VMEM limit above the 16/32 MiB defaults when needed,
    # but stay well below v7x's 64 MiB physical VMEM.
    vmem_limit = int(min(max(vmem_needed + (4 << 20), 16 << 20), 48 << 20))

    out = pl.pallas_call(
        kernel,
        out_shape=jax.ShapeDtypeStruct((N, E), table.dtype),
        grid_spec=pltpu.PrefetchScalarGridSpec(
            num_scalar_prefetch=1,                    # flat token ids -> SMEM
            grid=(grid,),
            in_specs=[table_spec],
            out_specs=pl.BlockSpec((rt, E), lambda i, tok: (i, 0)),
            scratch_shapes=scratch_shapes,
        ),
        compiler_params=pltpu.CompilerParams(
            dimension_semantics=("parallel",),        # row tiles shard across TCs
            vmem_limit_bytes=vmem_limit,
        ),
    )(flat_tok, table)

    return out.reshape(B, S, E)


if __name__ == "__main__":
    # Module config (synthetic, deterministic init — nn.Embedding default is N(0, 1)).
    vocab_size = 64
    emb_size = 128
    batch, seq = 2, 8

    key = jax.random.PRNGKey(0)
    k_w, k_t = jax.random.split(key)
    embedding_weight = jax.random.normal(k_w, (vocab_size, emb_size), dtype=jnp.float32)
    tokens = jax.random.randint(k_t, (batch, seq), 0, vocab_size, dtype=jnp.int32)

    out = token_embedding(tokens, embedding_weight)
    out = jax.block_until_ready(out)

    # Sanity check against plain-JAX gather (same semantics as nn.Embedding forward).
    ref = jnp.take(embedding_weight, tokens, axis=0)
    assert out.shape == (batch, seq, emb_size)
    assert jnp.allclose(out, ref, atol=1e-6), "mismatch vs reference gather"

    print("KERNEL_OK")
</pallas_src>

<mosaic_0001>
module attributes {stable_mosaic.version = 11 : i64} {
  func.func @_vmem_gather_kernel(%arg0: i32, %arg1: memref<16xi32, #tpu.memory_space<smem>>, %arg2: memref<64x128xf32, #tpu.memory_space<vmem>>, %arg3: memref<8x128xf32, #tpu.memory_space<vmem>>) attributes {dimension_semantics = [#tpu.dimension_semantics<parallel>], iteration_bounds = array<i64: 2>, scalar_prefetch = 1 : i64, scratch_operands = 0 : i64, tpu.core_type = #tpu.core_type<tc>, window_params = [{pipeline_mode = #tpu.pipeline_mode<synchronous>, transform_indices = @transform_0, window_bounds = array<i64: 64, 128>}, {transform_indices = @transform_1, window_bounds = array<i64: 8, 128>}]} {
    %c8_i32 = arith.constant 8 : i32
    %0 = arith.muli %arg0, %c8_i32 : i32
    %c0_i32 = arith.constant 0 : i32
    %1 = arith.addi %0, %c0_i32 : i32
    %2 = arith.index_cast %1 : i32 to index
    %3 = memref.load %arg1[%2] : memref<16xi32, #tpu.memory_space<smem>>
    %4 = arith.index_cast %3 : i32 to index
    %c0 = arith.constant 0 : index
    %5 = vector.load %arg2[%4, %c0] : memref<64x128xf32, #tpu.memory_space<vmem>>, vector<1x128xf32>
    %6 = arith.index_cast %c0_i32 : i32 to index
    %c0_0 = arith.constant 0 : index
    %7 = vector.load %arg3[%6, %c0_0] : memref<8x128xf32, #tpu.memory_space<vmem>>, vector<1x128xf32>
    tpu.vector_store %arg3[%6, %c0_0], %5 {strides = array<i32>} : memref<8x128xf32, #tpu.memory_space<vmem>>, vector<1x128xf32>,
    %c1_i32 = arith.constant 1 : i32
    %8 = arith.addi %0, %c1_i32 : i32
    %9 = arith.index_cast %8 : i32 to index
    %10 = memref.load %arg1[%9] : memref<16xi32, #tpu.memory_space<smem>>
    %11 = arith.index_cast %10 : i32 to index
    %c0_1 = arith.constant 0 : index
    %12 = vector.load %arg2[%11, %c0_1] : memref<64x128xf32, #tpu.memory_space<vmem>>, vector<1x128xf32>
    %13 = arith.index_cast %c1_i32 : i32 to index
    %c0_2 = arith.constant 0 : index
    %14 = vector.load %arg3[%13, %c0_2] : memref<8x128xf32, #tpu.memory_space<vmem>>, vector<1x128xf32>
    tpu.vector_store %arg3[%13, %c0_2], %12 {strides = array<i32>} : memref<8x128xf32, #tpu.memory_space<vmem>>, vector<1x128xf32>,
    %c2_i32 = arith.constant 2 : i32
    %15 = arith.addi %0, %c2_i32 : i32
    %16 = arith.index_cast %15 : i32 to index
    %17 = memref.load %arg1[%16] : memref<16xi32, #tpu.memory_space<smem>>
    %18 = arith.index_cast %17 : i32 to index
    %c0_3 = arith.constant 0 : index
    %19 = vector.load %arg2[%18, %c0_3] : memref<64x128xf32, #tpu.memory_space<vmem>>, vector<1x128xf32>
    %20 = arith.index_cast %c2_i32 : i32 to index
    %c0_4 = arith.constant 0 : index
    %21 = vector.load %arg3[%20, %c0_4] : memref<8x128xf32, #tpu.memory_space<vmem>>, vector<1x128xf32>
    tpu.vector_store %arg3[%20, %c0_4], %19 {strides = array<i32>} : memref<8x128xf32, #tpu.memory_space<vmem>>, vector<1x128xf32>,
    %c3_i32 = arith.constant 3 : i32
    %22 = arith.addi %0, %c3_i32 : i32
    %23 = arith.index_cast %22 : i32 to index
    %24 = memref.load %arg1[%23] : memref<16xi32, #tpu.memory_space<smem>>
    %25 = arith.index_cast %24 : i32 to index
    %c0_5 = arith.constant 0 : index
    %26 = vector.load %arg2[%25, %c0_5] : memref<64x128xf32, #tpu.memory_space<vmem>>, vector<1x128xf32>
    %27 = arith.index_cast %c3_i32 : i32 to index
    %c0_6 = arith.constant 0 : index
    %28 = vector.load %arg3[%27, %c0_6] : memref<8x128xf32, #tpu.memory_space<vmem>>, vector<1x128xf32>
    tpu.vector_store %arg3[%27, %c0_6], %26 {strides = array<i32>} : memref<8x128xf32, #tpu.memory_space<vmem>>, vector<1x128xf32>,
    %c4_i32 = arith.constant 4 : i32
    %29 = arith.addi %0, %c4_i32 : i32
    %30 = arith.index_cast %29 : i32 to index
    %31 = memref.load %arg1[%30] : memref<16xi32, #tpu.memory_space<smem>>
    %32 = arith.index_cast %31 : i32 to index
    %c0_7 = arith.constant 0 : index
    %33 = vector.load %arg2[%32, %c0_7] : memref<64x128xf32, #tpu.memory_space<vmem>>, vector<1x128xf32>
    %34 = arith.index_cast %c4_i32 : i32 to index
    %c0_8 = arith.constant 0 : index
    %35 = vector.load %arg3[%34, %c0_8] : memref<8x128xf32, #tpu.memory_space<vmem>>, vector<1x128xf32>
    tpu.vector_store %arg3[%34, %c0_8], %33 {strides = array<i32>} : memref<8x128xf32, #tpu.memory_space<vmem>>, vector<1x128xf32>,
    %c5_i32 = arith.constant 5 : i32
    %36 = arith.addi %0, %c5_i32 : i32
    %37 = arith.index_cast %36 : i32 to index
    %38 = memref.load %arg1[%37] : memref<16xi32, #tpu.memory_space<smem>>
    %39 = arith.index_cast %38 : i32 to index
    %c0_9 = arith.constant 0 : index
    %40 = vector.load %arg2[%39, %c0_9] : memref<64x128xf32, #tpu.memory_space<vmem>>, vector<1x128xf32>
    %41 = arith.index_cast %c5_i32 : i32 to index
    %c0_10 = arith.constant 0 : index
    %42 = vector.load %arg3[%41, %c0_10] : memref<8x128xf32, #tpu.memory_space<vmem>>, vector<1x128xf32>
    tpu.vector_store %arg3[%41, %c0_10], %40 {strides = array<i32>} : memref<8x128xf32, #tpu.memory_space<vmem>>, vector<1x128xf32>,
    %c6_i32 = arith.constant 6 : i32
    %43 = arith.addi %0, %c6_i32 : i32
    %44 = arith.index_cast %43 : i32 to index
    %45 = memref.load %arg1[%44] : memref<16xi32, #tpu.memory_space<smem>>
    %46 = arith.index_cast %45 : i32 to index
    %c0_11 = arith.constant 0 : index
    %47 = vector.load %arg2[%46, %c0_11] : memref<64x128xf32, #tpu.memory_space<vmem>>, vector<1x128xf32>
    %48 = arith.index_cast %c6_i32 : i32 to index
    %c0_12 = arith.constant 0 : index
    %49 = vector.load %arg3[%48, %c0_12] : memref<8x128xf32, #tpu.memory_space<vmem>>, vector<1x128xf32>
    tpu.vector_store %arg3[%48, %c0_12], %47 {strides = array<i32>} : memref<8x128xf32, #tpu.memory_space<vmem>>, vector<1x128xf32>,
    %c7_i32 = arith.constant 7 : i32
    %50 = arith.addi %0, %c7_i32 : i32
    %51 = arith.index_cast %50 : i32 to index
    %52 = memref.load %arg1[%51] : memref<16xi32, #tpu.memory_space<smem>>
    %53 = arith.index_cast %52 : i32 to index
    %c0_13 = arith.constant 0 : index
    %54 = vector.load %arg2[%53, %c0_13] : memref<64x128xf32, #tpu.memory_space<vmem>>, vector<1x128xf32>
    %55 = arith.index_cast %c7_i32 : i32 to index
    %c0_14 = arith.constant 0 : index
    %56 = vector.load %arg3[%55, %c0_14] : memref<8x128xf32, #tpu.memory_space<vmem>>, vector<1x128xf32>
    tpu.vector_store %arg3[%55, %c0_14], %54 {strides = array<i32>} : memref<8x128xf32, #tpu.memory_space<vmem>>, vector<1x128xf32>,
    %c8_i32_15 = arith.constant 8 : i32
    return
  }
  func.func @transform_0(%arg0: i32, %arg1: memref<16xi32, #tpu.memory_space<smem>>) -> (i32, i32) {
    %c0_i32 = arith.constant 0 : i32
    %c0_i32_0 = arith.constant 0 : i32
    %c0_i32_1 = arith.constant 0 : i32
    return %c0_i32, %c0_i32_0 : i32, i32
  }
  func.func @transform_1(%arg0: i32, %arg1: memref<16xi32, #tpu.memory_space<smem>>) -> (i32, i32) {
    %c0_i32 = arith.constant 0 : i32
    %c0_i32_0 = arith.constant 0 : i32
    return %arg0, %c0_i32 : i32, i32
  }
}

</mosaic_0001>

<bundles_post_ra>
// kernel: token_embedding.1
= control target key start
LH: loop header
LB: loop body
LE: loop exit
PB: predicated region body
PF: predicated region fallthrough
CT: control target
= control target key end

     0   :  { %s570_s0 = inlined_call_operand.vmem [shape: s32[16], index: 0, kind: input, shape index: {}]   ;;  %s571_s1 = inlined_call_operand.hbm [shape: f32[64,128], index: 1, kind: input, shape index: {}]   ;;  %s572_s2 = inlined_call_operand.hbm [shape: f32[16,128], index: 2, kind: output, shape index: {}]  }
   0x1   :  { %s7_s11 = sshll.u32 %s570_s0, 4  ;;  %s8_s11 = int_to_ptr.vmem [resolvable:$true] %s7_s11 }
   0x2   :  { %s302_s12 = scalar_lea.vmem %s8_s11, 16  ;;  %p307_p1 = scmp.lt.s32.totalorder %s8_s11, %s8_s11 }
   0x3   :  { %p303_p0 = scmp.ne.s32.totalorder %s8_s11, %s302_s12  ;;  %p308_p2 = scmp.lt.s32.totalorder %s302_s12, %s302_s12 }
   0x5   :  { %p309_p3 = por %p308_p2, %p307_p1 }
   0x7   :  { %p310_p4 = pnand %p309_p3, %p303_p0 }
   0x9   :  { %313 = shalt.err (!%p310_p4)  }
   0xa   :  { %s412_s13 = smov [#allocation3]  }
   0xb   :  { %10 = dma.vmem_to_smem %s8_s11, 16, %s412_s13, [#allocation2] }
   0xc   :  { %386 = dma.done.wait [#allocation2], 16 }
   0xd   :  { %387 = vsyncadd [#allocation2], 4294967280 }
   0xe   :  { %12 = sfence }
   0xf   :  { %13 = vsyncpa [#allocation5], 0 }
  0x10   :  { %14 = vsyncpa [#allocation6], 0 }
  0x11   :  { %16 = vsyncpa [#allocation6 + $0x1], 0  ;;  %s435_s14 = smov 0   ;;  %s437_s15 = smov 0  }
  0x12   :  { %s439_s0 = smov 0   ;;  %s441_s16 = smov 0  }
  0x13 LB: > { %s456_s17 = sadd.s32 4294967295, %s410_s16   ;;  %s238_s18 = sadd.s32 4294967294, %s410_s16   ;;  %s410_s16 = sphi %s441_s16, %s590_s16   ;;  %s406_s0 = sphi %s439_s0, %s589_s0   ;;  %s402_s15 = sphi %s437_s15, %s588_s15   ;;  %s398_s14 = sphi %s435_s14, %s587_s14  }
  0x14   : > { %s460_s19 = sadd.s32 1, %s410_s16   ;;  %s50_s20 = sadd.s32 1, %s406_s0 }
  0x15   : > { %s47_s21 = ssub.s32 %s410_s16, %s460_s19  ;;  %p60_p5 = scmp.ne.s32.totalorder %s406_s0, %s402_s15 }
  0x16   : > { %p48_p6 = scmp.eq.s32.totalorder %s47_s21, 0  ;;  %p61_p7 = scmp.eq.s32.totalorder %s456_s17, 1 }
  0x17   : > { %p66_p8 = scmp.ne.s32.totalorder %s402_s15, %s398_s14  ;;  %p67_p9 = scmp.eq.s32.totalorder %s238_s18, 1 }
  0x18   : > { %s471_s22 = scalar_select %p48_p6, %s406_s0, %s50_s20  }
  0x19   : > { %p473_p10 = por %p61_p7, %p60_p5  ;;  %p477_p11 = por %p67_p9, %p66_p8 }
  0x1a   : > { %p239_p12 = scmp.ge.s32.totalorder %s410_s16, 1  ;;  %p74_p13 = scmp.lt.s32.totalorder %s410_s16, 3 }
  0x1b   : > { %s577_s23 = scalar_select %p473_p10, 1, 0 }
  0x1c   : > { %s578_s24 = scalar_select %p477_p11, 1, 0 }
  0x1d   : > { %p573_p0 = scmp.eq.s32.totalorder %s456_s17, 0  ;;  %p484_p1 = pnand %p239_p12, %p74_p13 }
  0x1e   : > { %s413_s26 = smov [#allocation4]   ;;  %s314_s3 = scalar_lea.hbm %s571_s1, 1024 }
  0x1f   : > { %s579_s25 = scalar_select %p484_p1, 1, 0 }
  0x20   : > { %s86_s27 = sshll.u32 %s413_s26, 4  ;;  %p255_p2 = pneg %p484_p1  ;;  %s87_s27 = int_to_ptr.vmem [resolvable:$true] %s86_s27 }
  0x21   : > { %p315_p4 = scmp.ne.s32.totalorder %s571_s1, %s314_s3  ;;  %p321_p8 = scmp.lt.u32.totalorder %s314_s3, %s571_s1 }
  0x22   : > { %p492_p3 = pnand %p573_p0, %p255_p2 }
  0x24   : > { %p316_p5 = pneg %p492_p3 }
  0x26   : > { %p317_p6 = pnand %p316_p5, %p315_p4 }
  0x28   : > { %p318_p7 = pneg %p317_p6 }
  0x2a   : > { %p323_p9 = pnand %p321_p8, %p318_p7 }
  0x2c   : > { %326 = shalt.err (!%p323_p9)
}
  0x2d   : > { %s327_s8 = scalar_lea.vmem %s87_s27, 1024  ;;  %p335_p0 = scmp.lt.s32.totalorder %s87_s27, %s87_s27 }
  0x2e   : > { %p328_p12 = scmp.ne.s32.totalorder %s87_s27, %s327_s8  ;;  %p336_p11 = scmp.lt.s32.totalorder %s327_s8, %s327_s8 }
  0x30   : > { %p330_p13 = pnand %p328_p12, %p316_p5  ;;  %p337_p10 = por %p336_p11, %p335_p0 }
  0x32   : > { %p331_p2 = pneg %p330_p13 }
  0x34   : > { %p338_p1 = pnand %p337_p10, %p331_p2 }
  0x36   : > { %341 = shalt.err (!%p338_p1)
}
  0x37   : > { %s414_s9 = smov 128   ;;  %s415_s10 = smov 8  }
  0x38   : > { %258 = dma.hbm_to_vmem [thread:$0]  (!%p492_p3), %s571_s1, 1024, %s87_s27, [#allocation5], %s414_s9, %s414_s9, %s415_s10  }
  0x39   : > { %p581_p4 = scmp.ne.s32.totalorder %s579_s25, 0 }
  0x3a   : > { %p582_p6 = scmp.eq.s32.totalorder (!%p581_p4), %s456_s17, 0 }
  0x3b   : > { %102 = sbr.rel (%p581_p4) target bundleno = 106 (0x6a), region = 24 }
  0x42   : > { %389 = dma.done.wait (%p582_p6), [#allocation5], 1024   ;;  %p583_p5 = pmov %p582_p6 }
  0x43   : > { %s576_s13 = sand.u32 1, %s402_s15   ;;  %s244_s18 = sshll.u32 %s456_s17, 3 }
  0x44   : > { %391 = vsyncadd (%p583_p5), [#allocation5], 4294966272  ;;  %s243_s20 = sshll.u32 %s576_s13, 3  ;;  %s118_s21 = sld [smem:[#allocation3 + %s244_s18]] }
  0x45   : > { %s122_s26 = sadd.s32 1, %s244_s18  ;;  %s127_s28 = sadd.s32 2, %s244_s18 }
  0x46   : > { %s123_s27 = sld [smem:[#allocation3 + %s122_s26]]  ;;  %s132_s25 = sadd.s32 3, %s244_s18 }
  0x47   : > { %s128_s29 = sld [smem:[#allocation3 + %s127_s28]]  ;;  %s137_s30 = sadd.s32 4, %s244_s18 }
  0x48   : > { %s133_s3 = sld [smem:[#allocation3 + %s132_s25]]  ;;  %s142_s5 = sadd.s32 5, %s244_s18 }
  0x49   : > { %s138_s4 = sld [smem:[#allocation3 + %s137_s30]]  ;;  %s147_s8 = sadd.s32 6, %s244_s18 }
  0x4a   : > { %s119_s6 = scalar_lea.vmem [#allocation4], %s118_s21  ;;  %s143_s7 = sld [smem:[#allocation3 + %s142_s5]] }
  0x4b   : > { %v120_v0 = vld [vmem:[%s119_s6] sm:$0x1]  ;;  %s116_s9 = scalar_lea.vmem [#allocation7], %s243_s20  ;;  %s148_s10 = sld [smem:[#allocation3 + %s147_s8]] }
  0x4c   : > { %121 = vst [vmem:[%s116_s9] sm:$0x1] %v120_v0  ;;  %s152_s11 = sadd.s32 7, %s244_s18  ;;  %s124_s12 = scalar_lea.vmem [#allocation4], %s123_s27 }
  0x4d   : > { %v125_v1 = vld [vmem:[%s124_s12] sm:$0x1]  ;;  %s129_s13 = scalar_lea.vmem [#allocation4], %s128_s29  ;;  %s153_s26 = sld [smem:[#allocation3 + %s152_s11]] }
  0x4e   : > { %v130_v2 = vld [vmem:[%s129_s13] sm:$0x1]  ;;  %126 = vst [vmem:[%s116_s9 + $0x1] sm:$0x1] %v125_v1  ;;  %s134_s28 = scalar_lea.vmem [#allocation4], %s133_s3  ;;  %s246_s21 = sshll.u32 %s456_s17, 7 }
  0x4f   : > { %131 = vst [vmem:[%s116_s9 + $0x2] sm:$0x1] %v130_v2  ;;  %v135_v3 = vld [vmem:[%s134_s28] sm:$0x1]  ;;  %s139_s25 = scalar_lea.vmem [#allocation4], %s138_s4  ;;  %s171_s20 = sshll.u32 %s116_s9, 4  ;;  %s528_s20 = int_to_ptr.vmem [resolvable:$true] %s171_s20 }
  0x50   : > { %v140_v4 = vld [vmem:[%s139_s25] sm:$0x1]  ;;  %136 = vst [vmem:[%s116_s9 + $0x3] sm:$0x1] %v135_v3  ;;  %s144_s30 = scalar_lea.vmem [#allocation4], %s143_s7  ;;  %s526_s29 = scalar_lea.hbm %s572_s2, %s246_s21 }
  0x51   : > { %141 = vst [vmem:[%s116_s9 + $0x4] sm:$0x1] %v140_v4  ;;  %v145_v5 = vld [vmem:[%s144_s30] sm:$0x1]  ;;  %s149_s18 = scalar_lea.vmem [#allocation4], %s148_s10  ;;  %s584_s3 = sand.u32 1, %s402_s15  }
  0x52   : > { %146 = vst [vmem:[%s116_s9 + $0x5] sm:$0x1] %v145_v5  ;;  %v150_v6 = vld [vmem:[%s149_s18] sm:$0x1]  ;;  %s158_s4 = scalar_lea.sflag [#allocation6], %s584_s3  ;;  %s342_s5 = scalar_lea.vmem %s528_s20, 128 }
  0x53   : > { %151 = vst [vmem:[%s116_s9 + $0x6] sm:$0x1] %v150_v6  ;;  %s154_s17 = scalar_lea.vmem [#allocation4], %s153_s26  ;;  %p343_p10 = scmp.ne.s32.totalorder %s528_s20, %s342_s5 }
  0x54   : > { %v155_v7 = vld [vmem:[%s154_s17] sm:$0x1]  ;;  %p585_p11 = scmp.ne.s32.totalorder %s577_s23, 0  ;;  %s416_s6 = smov [#allocation7]  }
  0x55   : > { %156 = vst [vmem:[%s116_s9 + $0x7] sm:$0x1] %v155_v7  ;;  %s346_s7 = sshll.u32 %s416_s6, 4  ;;  %s347_s7 = int_to_ptr.vmem [resolvable:$false] %s346_s7 }
  0x56   : > { %p344_p0 = pnand %p343_p10, %p585_p11  ;;  %s348_s8 = scalar_lea.vmem %s347_s7, 256 }
  0x57   : > { %p349_p3 = scmp.lt.s32.totalorder %s528_s20, %s347_s7  ;;  %p350_p7 = scmp.lt.s32.totalorder %s348_s8, %s342_s5 }
  0x58   : > { %p345_p1 = pneg %p344_p0 }
  0x59   : > { %p351_p8 = por %p350_p7, %p349_p3 }
  0x5b   : > { %p352_p9 = pnand %p351_p8, %p345_p1 }
  0x5d   : > { %355 = shalt.err (!%p352_p9)
}
  0x5e   : > { %s356_s9 = scalar_lea.hbm %s526_s29, 128  ;;  %s360_s12 = scalar_lea.hbm %s572_s2, 256 }
  0x5f   : > { %p357_p12 = scmp.ne.s32.totalorder %s526_s29, %s356_s9  ;;  %p361_p4 = scmp.lt.u32.totalorder %s526_s29, %s572_s2 }
  0x60   : > { %p362_p6 = scmp.lt.u32.totalorder %s360_s12, %s356_s9  ;;  %p364_p10 = scmp.lt.u32.totalorder %s356_s9, %s526_s29 }
  0x61   : > { %p358_p13 = pnand %p357_p12, %p585_p11 }
  0x62   : > { %p363_p5 = por %p362_p6, %p361_p4 }
  0x63   : > { %p359_p2 = pneg %p358_p13 }
  0x64   : > { %p365_p0 = por %p364_p10, %p363_p5 }
  0x66   : > { %p366_p1 = pnand %p365_p0, %p359_p2 }
  0x68   : > { %369 = shalt.err (!%p366_p1)
}
  0x69   : > { %253 = dma.vmem_to_hbm [thread:$0]  (%p585_p11), %s528_s20, 128, %s526_s29, %s158_s4  }
  0x6a PF: > { %p265_p3 = scmp.ge.s32.totalorder %s410_s16, 2  ;;  %s183_s25 = sand.u32 1, %s398_s14  }
  0x6b   : > { %p586_p7 = scmp.ne.s32.totalorder %s578_s24, 0  ;;  %s184_s21 = scalar_lea.sflag [#allocation6], %s183_s25 }
  0x6d   : > { %p260_p8 = pnand %p265_p3, %p586_p7 }
  0x6f   : > { %393 = dma.done.wait (!%p260_p8), %s184_s21, 128  }
  0x70   : > { %395 = vsyncadd (!%p260_p8), %s184_s21, 4294967168  ;;  %p19_p9 = scmp.ge.s32.totalorder %s460_s19, 4   ;;  %s587_s14 = smov %s402_s15 }
  0x71   : > { %s588_s15 = smov %s406_s0  ;;  %s589_s0 = smov %s471_s22 }
  0x72   : > { %s590_s16 = smov %s460_s19  ;;  %21 = sbr.rel (!%p19_p9) target bundleno = 19 (0x13), region = 69 }
  0x79   :  { %189 = vsyncpa [#allocation5], 1 }
  0x7a   :  { %191 = vsyncpa [#allocation5 + $0x1], 1 }
  0x7b   :  { %192 = vsyncpa [#allocation6], 1 }
  0x7c   :  { %194 = vsyncpa [#allocation6 + $0x1], 1 }

</bundles_post_ra>
